<compile_context>
chip_gen: v6e
topology: v6e:2x2x1
jax: 0.10.0
libtpu: 0.0.40
codegen_flags: <defaults>
</compile_context>

<pallas_src>
import functools

import jax
import jax.numpy as jnp
from jax.experimental import pallas as pl
from jax.experimental.pallas import tpu as pltpu


def _ffm_kernel(x_ref, o_ref, *, num_fields: int):
    """x_ref: (Bt, N*N, E) VMEM tile.  o_ref: (Bt, NC2, E) VMEM tile."""
    N = num_fields
    p0 = 0
    for i in range(N - 1):
        cnt = N - 1 - i
        # a-side: rows i*N + j for j in (i+1 .. N-1) are contiguous -> one block read.
        a = x_ref[:, i * N + i + 1 : i * N + N, :]                     # (Bt, cnt, E)
        # b-side: rows j*N + i (stride N) gathered with static single-row slices.
        b = jnp.concatenate(
            [x_ref[:, j * N + i : j * N + i + 1, :] for j in range(i + 1, N)],
            axis=1,
        )                                                              # (Bt, cnt, E)
        # One contiguous store per i (pairs for fixed i are consecutive in output).
        o_ref[:, p0 : p0 + cnt, :] = a * b
        p0 += cnt


@functools.partial(jax.jit, static_argnames=("num_fields",))
def ffm_layer(field_emb_inputs: jax.Array, num_fields: int) -> jax.Array:
    """field_emb_inputs: (B, N*N, E) -> (B, NC2, E)."""
    B, NN, E = field_emb_inputs.shape
    N = num_fields
    assert NN == N * N, "second dim must be num_fields**2"
    P = N * (N - 1) // 2
    if P == 0:
        # num_fields <= 1: no pairs; avoid a zero-size grid / output block.
        return jnp.zeros((B, 0, E), dtype=field_emb_inputs.dtype)

    # Pick the batch-tile size so that double-buffered (in + out) blocks stay
    # well under every generation's default scoped VMEM limit (16 MiB on v5e).
    itemsize = jnp.dtype(field_emb_inputs.dtype).itemsize
    bytes_per_batch_row = (NN + P) * E * itemsize          # in + out per batch row
    vmem_block_budget = 8 * 1024 * 1024                    # for 2x double-buffered blocks
    bt = max(1, vmem_block_budget // (2 * bytes_per_batch_row))
    bt = int(min(bt, B))
    grid = (pl.cdiv(B, bt),)

    kernel = functools.partial(_ffm_kernel, num_fields=N)

    out = pl.pallas_call(
        kernel,
        out_shape=jax.ShapeDtypeStruct((B, P, E), field_emb_inputs.dtype),
        grid_spec=pltpu.PrefetchScalarGridSpec(
            num_scalar_prefetch=0,
            grid=grid,
            # Last two block dims equal the full array dims -> (8,128) rule satisfied.
            in_specs=[pl.BlockSpec((bt, NN, E), lambda b: (b, 0, 0))],
            out_specs=pl.BlockSpec((bt, P, E), lambda b: (b, 0, 0)),
        ),
        compiler_params=pltpu.CompilerParams(
            # Batch tiles are fully independent -> shard across TCs on v7x megacore.
            dimension_semantics=("parallel",),
        ),
    )(field_emb_inputs)

    # TODO(synk): nn.Dropout(p=0.0) is identity; non-zero dropout would need
    # pltpu.prng_seed + pltpu.stateful_bernoulli masking inside the kernel.
    return out


def _ffm_reference(field_emb_inputs: jax.Array, num_fields: int) -> jax.Array:
    B, NN, E = field_emb_inputs.shape
    N = num_fields
    x = field_emb_inputs.reshape(B, N, N, E)
    outs = []
    for i in range(N - 1):
        for j in range(i + 1, N):
            outs.append(x[:, i, j] * x[:, j, i])
    return jnp.stack(outs, axis=1)


if __name__ == "__main__":
    B, N, E = 2, 4, 32  # batch, num_fields, embed dim
    key = jax.random.PRNGKey(0)
    field_emb_inputs = jax.random.normal(key, (B, N * N, E), dtype=jnp.float32)

    y = ffm_layer(field_emb_inputs, num_fields=N)
    y = jax.block_until_ready(y)

    y_ref = _ffm_reference(field_emb_inputs, N)
    assert y.shape == (B, N * (N - 1) // 2, E)
    assert jnp.allclose(y, y_ref, atol=1e-6, rtol=1e-6)

    print("KERNEL_OK")
</pallas_src>

<mosaic_0001>
module attributes {stable_mosaic.version = 11 : i64} {
  func.func @_ffm_kernel(%arg0: i32, %arg1: memref<2x16x32xf32, #tpu.memory_space<vmem>>, %arg2: memref<2x6x32xf32, #tpu.memory_space<vmem>>) attributes {dimension_semantics = [#tpu.dimension_semantics<parallel>], iteration_bounds = array<i64: 1>, scalar_prefetch = 0 : i64, scratch_operands = 0 : i64, tpu.core_type = #tpu.core_type<tc>, window_params = [{transform_indices = @transform_0, window_bounds = array<i64: 2, 16, 32>}, {transform_indices = @transform_1, window_bounds = array<i64: 2, 6, 32>}]} {
    %c0 = arith.constant 0 : index
    %c1 = arith.constant 1 : index
    %c0_0 = arith.constant 0 : index
    %0 = vector.load %arg1[%c0, %c1, %c0_0] : memref<2x16x32xf32, #tpu.memory_space<vmem>>, vector<2x3x32xf32>
    %c0_1 = arith.constant 0 : index
    %c4 = arith.constant 4 : index
    %c0_2 = arith.constant 0 : index
    %1 = vector.load %arg1[%c0_1, %c4, %c0_2] : memref<2x16x32xf32, #tpu.memory_space<vmem>>, vector<2x1x32xf32>
    %c0_3 = arith.constant 0 : index
    %c8 = arith.constant 8 : index
    %c0_4 = arith.constant 0 : index
    %2 = vector.load %arg1[%c0_3, %c8, %c0_4] : memref<2x16x32xf32, #tpu.memory_space<vmem>>, vector<2x1x32xf32>
    %c0_5 = arith.constant 0 : index
    %c12 = arith.constant 12 : index
    %c0_6 = arith.constant 0 : index
    %3 = vector.load %arg1[%c0_5, %c12, %c0_6] : memref<2x16x32xf32, #tpu.memory_space<vmem>>, vector<2x1x32xf32>
    %4 = tpu.concatenate %1, %2, %3 in 1 : vector<2x1x32xf32>, vector<2x1x32xf32>, vector<2x1x32xf32> -> vector<2x3x32xf32>
    %5 = arith.mulf %0, %4 : vector<2x3x32xf32>
    %c0_7 = arith.constant 0 : index
    %c0_8 = arith.constant 0 : index
    %c0_9 = arith.constant 0 : index
    %6 = vector.load %arg2[%c0_7, %c0_8, %c0_9] : memref<2x6x32xf32, #tpu.memory_space<vmem>>, vector<2x3x32xf32>
    tpu.vector_store %arg2[%c0_7, %c0_8, %c0_9], %5 {strides = array<i32>} : memref<2x6x32xf32, #tpu.memory_space<vmem>>, vector<2x3x32xf32>,
    %c0_10 = arith.constant 0 : index
    %c6 = arith.constant 6 : index
    %c0_11 = arith.constant 0 : index
    %7 = vector.load %arg1[%c0_10, %c6, %c0_11] : memref<2x16x32xf32, #tpu.memory_space<vmem>>, vector<2x2x32xf32>
    %c0_12 = arith.constant 0 : index
    %c9 = arith.constant 9 : index
    %c0_13 = arith.constant 0 : index
    %8 = vector.load %arg1[%c0_12, %c9, %c0_13] : memref<2x16x32xf32, #tpu.memory_space<vmem>>, vector<2x1x32xf32>
    %c0_14 = arith.constant 0 : index
    %c13 = arith.constant 13 : index
    %c0_15 = arith.constant 0 : index
    %9 = vector.load %arg1[%c0_14, %c13, %c0_15] : memref<2x16x32xf32, #tpu.memory_space<vmem>>, vector<2x1x32xf32>
    %10 = tpu.concatenate %8, %9 in 1 : vector<2x1x32xf32>, vector<2x1x32xf32> -> vector<2x2x32xf32>
    %11 = arith.mulf %7, %10 : vector<2x2x32xf32>
    %c0_16 = arith.constant 0 : index
    %c3 = arith.constant 3 : index
    %c0_17 = arith.constant 0 : index
    %12 = vector.load %arg2[%c0_16, %c3, %c0_17] : memref<2x6x32xf32, #tpu.memory_space<vmem>>, vector<2x2x32xf32>
    tpu.vector_store %arg2[%c0_16, %c3, %c0_17], %11 {strides = array<i32>} : memref<2x6x32xf32, #tpu.memory_space<vmem>>, vector<2x2x32xf32>,
    %c0_18 = arith.constant 0 : index
    %c11 = arith.constant 11 : index
    %c0_19 = arith.constant 0 : index
    %13 = vector.load %arg1[%c0_18, %c11, %c0_19] : memref<2x16x32xf32, #tpu.memory_space<vmem>>, vector<2x1x32xf32>
    %c0_20 = arith.constant 0 : index
    %c14 = arith.constant 14 : index
    %c0_21 = arith.constant 0 : index
    %14 = vector.load %arg1[%c0_20, %c14, %c0_21] : memref<2x16x32xf32, #tpu.memory_space<vmem>>, vector<2x1x32xf32>
    %15 = arith.mulf %13, %14 : vector<2x1x32xf32>
    %c0_22 = arith.constant 0 : index
    %c5 = arith.constant 5 : index
    %c0_23 = arith.constant 0 : index
    %16 = vector.load %arg2[%c0_22, %c5, %c0_23] : memref<2x6x32xf32, #tpu.memory_space<vmem>>, vector<2x1x32xf32>
    tpu.vector_store %arg2[%c0_22, %c5, %c0_23], %15 {strides = array<i32>} : memref<2x6x32xf32, #tpu.memory_space<vmem>>, vector<2x1x32xf32>,
    return
  }
  func.func @transform_0(%arg0: i32) -> (i32, i32, i32) {
    %c0_i32 = arith.constant 0 : i32
    %c0_i32_0 = arith.constant 0 : i32
    %c0_i32_1 = arith.constant 0 : i32
    return %arg0, %c0_i32, %c0_i32_0 : i32, i32, i32
  }
  func.func @transform_1(%arg0: i32) -> (i32, i32, i32) {
    %c0_i32 = arith.constant 0 : i32
    %c0_i32_0 = arith.constant 0 : i32
    %c0_i32_1 = arith.constant 0 : i32
    return %arg0, %c0_i32, %c0_i32_0 : i32, i32, i32
  }
}

</mosaic_0001>

<bundles_post_ra>
// kernel: ffm_layer.1
= control target key start
LH: loop header
LB: loop body
LE: loop exit
PB: predicated region body
PF: predicated region fallthrough
CT: control target
= control target key end

     0   :  { %6 = vsyncpa [#allocation3], 0  ;;  %s111_s6 = smov [#allocation2]   ;;  %s157_s0 = inlined_call_operand.hbm [shape: f32[2,16,32], index: 0, kind: input, shape index: {}]   ;;  %s158_s1 = inlined_call_operand.vmem [shape: f32[2,6,32], index: 1, kind: output, shape index: {}]  }
   0x1   :  { %s12_s7 = sshll.u32 %s111_s6, 4  ;;  %s13_s7 = int_to_ptr.vmem [resolvable:$true] %s12_s7 }
   0x2   :  { %s97_s8 = scalar_lea.vmem %s13_s7, 512  ;;  %p102_p1 = scmp.lt.s32.totalorder %s13_s7, %s13_s7 }
   0x3   :  { %p98_p0 = scmp.ne.s32.totalorder %s13_s7, %s97_s8  ;;  %p103_p2 = scmp.lt.s32.totalorder %s97_s8, %s97_s8 }
   0x5   :  { %p104_p3 = por %p103_p2, %p102_p1 }
   0x7   :  { %p105_p4 = pnand %p104_p3, %p98_p0 }
   0x9   :  { %108 = shalt.err (!%p105_p4)
}
   0xa   :  { %s112_s9 = smov 128   ;;  %s113_s10 = smov 8  }
   0xb   :  { %18 = dma.hbm_to_vmem [thread:$0]  %s157_s0, 512, %s13_s7, [#allocation3], %s112_s9, %s112_s9, %s113_s10  }
   0xc   :  { %109 = dma.done.wait [#allocation3], 512  }
   0xd   :  { %110 = vsyncadd [#allocation3], 4294966784  ;;  %v24_v0 = vld [vmem:[#allocation2 + $0x4] sm:$0x1]  ;;  %v26_v1 = vld [vmem:[#allocation2 + $0x8] sm:$0x1] }
   0xe   :  { %vm42_vm0 = vcmask 1040384   ;;  %v22_v2 = vld [vmem:[#allocation2 + $0x1] sm:$0x7]  ;;  %v28_v3 = vld [vmem:[#allocation2 + $0xc] sm:$0x1]  ;;  %v32_v4 = vrot.slane %v26_v1, 7 }
   0xf   :  { %vm45_vm1 = vcmask 1041408   ;;  %v38_v5 = vrot.slane %v28_v3, 6  ;;  %v23_v6 = vld [vmem:[#allocation2 + $0x11] sm:$0x7]  ;;  %v25_v7 = vld [vmem:[#allocation2 + $0x14] sm:$0x1] }
  0x10   :  { %v27_v8 = vld [vmem:[#allocation2 + $0x18] sm:$0x1]  ;;  %v43_v9 = vsel %vm42_vm0, %v24_v0, %v32_v4  ;;  %vm50_vm2 = vcmask 256000   ;;  %v29_v10 = vld [vmem:[#allocation2 + $0x1c] sm:$0x1]  ;;  %vm69_vm3 = vcmask 254976  }
  0x11   :  { %v33_v11 = vrot.slane %v27_v8, 7  ;;  %v53_v12 = vld [vmem:[#allocation2 + $0x6] sm:$0x3]  ;;  %v46_v13 = vsel %vm45_vm1, %v43_v9, %v38_v5  ;;  %v39_v14 = vrot.slane %v29_v10, 6  ;;  %v55_v15 = vld [vmem:[#allocation2 + $0x9] sm:$0x1] }
  0x12   :  { %v57_v16 = vld [vmem:[#allocation2 + $0xd] sm:$0x1]  ;;  %v48_v17 = vmul.f32 %v46_v13, %v22_v2  ;;  %v54_v20 = vld [vmem:[#allocation2 + $0x16] sm:$0x3]  ;;  %v56_v21 = vld [vmem:[#allocation2 + $0x19] sm:$0x1] }
  0x13   :  { %v44_v18 = vsel %vm42_vm0, %v25_v7, %v33_v11  ;;  %v61_v19 = vrot.slane %v57_v16, 7  ;;  %vm78_vm4 = vcmask 253952   ;;  %v58_v23 = vld [vmem:[#allocation2 + $0x1d] sm:$0x1]  ;;  %v72_v24 = vld [vmem:[#allocation2 + $0xb] sm:$0x1] }
  0x14   :  { %v47_v22 = vsel %vm45_vm1, %v44_v18, %v39_v14  ;;  %v74_v25 = vld [vmem:[#allocation2 + $0xe] sm:$0x1]  ;;  %51 = vst.msk [vmem:[%s158_s1] sm:$0x7] %vm50_vm2, %v48_v17  ;;  %v62_v28 = vrot.slane %v58_v23, 7 }
  0x15   :  { %v49_v26 = vmul.f32 %v47_v22, %v23_v6  ;;  %v65_v27 = vsel %vm42_vm0, %v55_v15, %v61_v19  ;;  %v76_v29 = vmul.f32 %v74_v25, %v72_v24  ;;  %v73_v30 = vld [vmem:[#allocation2 + $0x1b] sm:$0x1]  ;;  %v75_v31 = vld [vmem:[#allocation2 + $0x1e] sm:$0x1] }
  0x16   :  { %v67_v32 = vmul.f32 %v65_v27, %v53_v12  ;;  %v77_v33 = vmul.f32 %v75_v31, %v73_v30  ;;  %v66_v34 = vsel %vm42_vm0, %v56_v21, %v62_v28 }
  0x17   :  { %52 = vst.msk [vmem:[%s158_s1 + $0x8] sm:$0x7] %vm50_vm2, %v49_v26  ;;  %v68_v35 = vmul.f32 %v66_v34, %v54_v20 }
  0x18   :  { %79 = vst.msk [vmem:[%s158_s1 + $0x5] sm:$0x1] %vm78_vm4, %v76_v29  ;;  %80 = vst.msk [vmem:[%s158_s1 + $0xd] sm:$0x1] %vm78_vm4, %v77_v33 }
  0x19   :  { %70 = vst.msk [vmem:[%s158_s1 + $0x3] sm:$0x3] %vm69_vm3, %v67_v32  ;;  %71 = vst.msk [vmem:[%s158_s1 + $0xb] sm:$0x3] %vm69_vm3, %v68_v35 }
  0x1a   :  { %85 = vsyncpa [#allocation3], 1 }

</bundles_post_ra>
